<compile_context>
chip_gen: v5e
topology: v5e:2x2
jax: 0.10.0
libtpu: 0.0.40
codegen_flags: <defaults>
</compile_context>

<pallas_src>
import jax
import jax.numpy as jnp
from jax.experimental import pallas as pl
from jax.experimental.pallas import tpu as pltpu


def _se_kernel(x_ref, w1t_ref, b1_ref, w2t_ref, b2_ref, o_ref):
    x = x_ref[...]                                   # (BT, C, HW), input dtype
    hw = x_ref.shape[-1]

    # Squeeze: global average pool over spatial lanes, accumulated in f32.
    s = jnp.sum(x, axis=-1, dtype=jnp.float32) * jnp.float32(1.0 / hw)   # (BT, C)

    # Excite: fc1 (1x1 conv) + ReLU, fc2 (1x1 conv) + sigmoid.
    h = jnp.dot(s, w1t_ref[...], preferred_element_type=jnp.float32) + b1_ref[...]
    h = jnp.maximum(h, 0.0)                          # (BT, R)
    g = jnp.dot(h, w2t_ref[...], preferred_element_type=jnp.float32) + b2_ref[...]
    g = jax.nn.sigmoid(g)                            # (BT, C)

    # Scale: per-(sample, channel) gate broadcast over HW.  Multiply stays in
    # the input dtype — no full-block f32 copy of x is materialized.
    o_ref[...] = (x * g.astype(x.dtype)[:, :, None]).astype(o_ref.dtype)


def _choose_block_batch(n, c, hw, itemsize, vmem_block_budget=40 * 1024 * 1024):
    """Largest divisor of n whose double-buffered in+out blocks fit the budget,
    while keeping >= 2 grid steps so both v7x TensorCores get work."""
    per_sample = c * hw * itemsize
    # Pipelined footprint ~= 2x input block + 2x output block.
    max_bt = max(1, vmem_block_budget // (4 * per_sample))
    if n >= 2:
        max_bt = min(max_bt, n // 2)
    max_bt = max(1, min(max_bt, n))
    for bt in range(max_bt, 0, -1):
        if n % bt == 0:
            return bt
    return 1


def se_module(x, w1, b1, w2, b2):
    """x: (N, C, H, W); w1: (R, C); b1: (R,); w2: (C, R); b2: (C,)."""
    N, C, H, W = x.shape
    R = w1.shape[0]
    HW = H * W
    itemsize = jnp.dtype(x.dtype).itemsize

    x_flat = x.reshape(N, C, HW)
    # Present the 1x1-conv weights so the batched matmuls are (BT,C)@(C,R)
    # and (BT,R)@(R,C); biases as lane-vectors for a broadcast add.
    w1t = jnp.transpose(w1).astype(jnp.float32)      # (C, R)
    w2t = jnp.transpose(w2).astype(jnp.float32)      # (R, C)
    b1r = b1.reshape(1, R).astype(jnp.float32)
    b2r = b2.reshape(1, C).astype(jnp.float32)

    bt = _choose_block_batch(N, C, HW, itemsize)
    grid = (N // bt,)

    # Explicit VMEM budget: pipelined x/o blocks + weights + margin, capped
    # well below v7x's 64 MiB physical VMEM (also fine on v5e/v6e).
    block_bytes = bt * C * HW * itemsize
    weight_bytes = (w1t.size + w2t.size + b1r.size + b2r.size) * 4
    vmem_limit = min(4 * block_bytes + 2 * weight_bytes + (4 << 20), 48 << 20)
    vmem_limit = max(vmem_limit, 16 << 20)

    # TODO(synk): for very large spatial maps where even bt=1 blows the VMEM
    # budget, split HW into a pooled-sum pass + scale pass (extra HBM read of x).

    cost = pl.CostEstimate(
        flops=int(4 * N * C * R + 2 * N * C * HW),
        transcendentals=int(N * C),
        bytes_accessed=int(2 * N * C * HW * itemsize),
    )

    out_flat = pl.pallas_call(
        _se_kernel,
        out_shape=jax.ShapeDtypeStruct((N, C, HW), x.dtype),
        grid_spec=pltpu.PrefetchScalarGridSpec(
            num_scalar_prefetch=0,
            grid=grid,
            in_specs=[
                pl.BlockSpec((bt, C, HW), lambda n: (n, 0, 0)),
                pl.BlockSpec((C, R), lambda n: (0, 0)),
                pl.BlockSpec((1, R), lambda n: (0, 0)),
                pl.BlockSpec((R, C), lambda n: (0, 0)),
                pl.BlockSpec((1, C), lambda n: (0, 0)),
            ],
            out_specs=pl.BlockSpec((bt, C, HW), lambda n: (n, 0, 0)),
        ),
        compiler_params=pltpu.CompilerParams(
            dimension_semantics=("parallel",),
            vmem_limit_bytes=int(vmem_limit),
        ),
        cost_estimate=cost,
    )(x_flat, w1t, b1r, w2t, b2r)

    return out_flat.reshape(N, C, H, W)


def init_se_params(key, channels, reduction=16, min_channels=8,
                   reduction_channels=None):
    """Deterministic init mimicking nn.Conv2d default (kaiming-uniform-ish)."""
    reduction_channels = reduction_channels or max(channels // reduction,
                                                   min_channels)
    k1, k2, k3, k4 = jax.random.split(key, 4)
    bound1 = 1.0 / (channels ** 0.5)
    bound2 = 1.0 / (reduction_channels ** 0.5)
    w1 = jax.random.uniform(k1, (reduction_channels, channels),
                            jnp.float32, -bound1, bound1)
    b1 = jax.random.uniform(k2, (reduction_channels,),
                            jnp.float32, -bound1, bound1)
    w2 = jax.random.uniform(k3, (channels, reduction_channels),
                            jnp.float32, -bound2, bound2)
    b2 = jax.random.uniform(k4, (channels,),
                            jnp.float32, -bound2, bound2)
    return w1, b1, w2, b2


def se_module_ref(x, w1, b1, w2, b2):
    """Pure-JAX reference for correctness check."""
    s = jnp.mean(x, axis=(2, 3))                                 # (N, C)
    h = jnp.maximum(s @ w1.T + b1, 0.0)                          # (N, R)
    g = jax.nn.sigmoid(h @ w2.T + b2)                            # (N, C)
    return x * g[:, :, None, None]


if __name__ == "__main__":
    key = jax.random.PRNGKey(0)
    k_x, k_p = jax.random.split(key)

    N, C, H, W = 2, 4, 16, 16     # reduction_channels = max(4 // 16, 8) = 8
    x = jax.random.normal(k_x, (N, C, H, W), jnp.float32)
    w1, b1, w2, b2 = init_se_params(k_p, channels=C)

    out = se_module(x, w1, b1, w2, b2)
    out = jax.block_until_ready(out)

    ref = se_module_ref(x, w1, b1, w2, b2)
    assert out.shape == (N, C, H, W)
    assert jnp.allclose(out, ref, atol=1e-5, rtol=1e-5)

    print("KERNEL_OK")
</pallas_src>

<mosaic_0001>
module attributes {stable_mosaic.version = 11 : i64} {
  func.func @_se_kernel(%arg0: i32, %arg1: memref<1x4x256xf32, #tpu.memory_space<vmem>>, %arg2: memref<4x8xf32, #tpu.memory_space<vmem>>, %arg3: memref<1x8xf32, #tpu.memory_space<vmem>>, %arg4: memref<8x4xf32, #tpu.memory_space<vmem>>, %arg5: memref<1x4xf32, #tpu.memory_space<vmem>>, %arg6: memref<1x4x256xf32, #tpu.memory_space<vmem>>) attributes {dimension_semantics = [#tpu.dimension_semantics<parallel>], iteration_bounds = array<i64: 2>, scalar_prefetch = 0 : i64, scratch_operands = 0 : i64, tpu.core_type = #tpu.core_type<tc>, window_params = [{transform_indices = @transform_0, window_bounds = array<i64: 1, 4, 256>}, {pipeline_mode = #tpu.pipeline_mode<synchronous>, transform_indices = @transform_1, window_bounds = array<i64: 4, 8>}, {pipeline_mode = #tpu.pipeline_mode<synchronous>, transform_indices = @transform_2, window_bounds = array<i64: 1, 8>}, {pipeline_mode = #tpu.pipeline_mode<synchronous>, transform_indices = @transform_3, window_bounds = array<i64: 8, 4>}, {pipeline_mode = #tpu.pipeline_mode<synchronous>, transform_indices = @transform_4, window_bounds = array<i64: 1, 4>}, {transform_indices = @transform_5, window_bounds = array<i64: 1, 4, 256>}]} {
    %c0 = arith.constant 0 : index
    %c0_0 = arith.constant 0 : index
    %c0_1 = arith.constant 0 : index
    %0 = vector.load %arg1[%c0, %c0_0, %c0_1] : memref<1x4x256xf32, #tpu.memory_space<vmem>>, vector<1x4x256xf32>
    %cst = arith.constant dense<0.000000e+00> : vector<1x4xf32>
    %1 = vector.multi_reduction <add>, %0, %cst [2] : vector<1x4x256xf32> to vector<1x4xf32>
    %cst_2 = arith.constant 3.906250e-03 : f32
    %2 = vector.broadcast %cst_2 : f32 to vector<1x4xf32>
    %3 = arith.mulf %1, %2 : vector<1x4xf32>
    %c0_3 = arith.constant 0 : index
    %c0_4 = arith.constant 0 : index
    %4 = vector.load %arg2[%c0_3, %c0_4] : memref<4x8xf32, #tpu.memory_space<vmem>>, vector<4x8xf32>
    %cst_5 = arith.constant dense<0.000000e+00> : vector<1x8xf32>
    %5 = tpu.matmul %3, %4, %cst_5 {dimension_numbers = #tpu.dot_dimension_numbers<[1], [0], [0], [1], [0, 0, 1, 1], [], []>} : vector<1x4xf32>, vector<4x8xf32>, vector<1x8xf32> -> vector<1x8xf32>
    %c0_6 = arith.constant 0 : index
    %c0_7 = arith.constant 0 : index
    %6 = vector.load %arg3[%c0_6, %c0_7] : memref<1x8xf32, #tpu.memory_space<vmem>>, vector<1x8xf32>
    %7 = arith.addf %5, %6 : vector<1x8xf32>
    %cst_8 = arith.constant 0.000000e+00 : f32
    %8 = vector.broadcast %cst_8 : f32 to vector<1x8xf32>
    %9 = arith.maximumf %7, %8 : vector<1x8xf32>
    %c0_9 = arith.constant 0 : index
    %c0_10 = arith.constant 0 : index
    %10 = vector.load %arg4[%c0_9, %c0_10] : memref<8x4xf32, #tpu.memory_space<vmem>>, vector<8x4xf32>
    %cst_11 = arith.constant dense<0.000000e+00> : vector<1x4xf32>
    %11 = tpu.matmul %9, %10, %cst_11 {dimension_numbers = #tpu.dot_dimension_numbers<[1], [0], [0], [1], [0, 0, 1, 1], [], []>} : vector<1x8xf32>, vector<8x4xf32>, vector<1x4xf32> -> vector<1x4xf32>
    %c0_12 = arith.constant 0 : index
    %c0_13 = arith.constant 0 : index
    %12 = vector.load %arg5[%c0_12, %c0_13] : memref<1x4xf32, #tpu.memory_space<vmem>>, vector<1x4xf32>
    %13 = arith.addf %11, %12 : vector<1x4xf32>
    %14 = arith.negf %13 : vector<1x4xf32>
    %15 = math.exp %14 : vector<1x4xf32>
    %cst_14 = arith.constant 1.000000e+00 : f32
    %16 = vector.broadcast %cst_14 : f32 to vector<1x4xf32>
    %17 = arith.addf %16, %15 : vector<1x4xf32>
    %18 = arith.divf %16, %17 : vector<1x4xf32>
    %19 = vector.shape_cast %18 : vector<1x4xf32> to vector<1x4x1xf32>
    %20 = vector.broadcast %19 : vector<1x4x1xf32> to vector<1x4x256xf32>
    %21 = arith.mulf %0, %20 : vector<1x4x256xf32>
    %c0_15 = arith.constant 0 : index
    %c0_16 = arith.constant 0 : index
    %c0_17 = arith.constant 0 : index
    %22 = vector.load %arg6[%c0_15, %c0_16, %c0_17] : memref<1x4x256xf32, #tpu.memory_space<vmem>>, vector<1x4x256xf32>
    tpu.vector_store %arg6[%c0_15, %c0_16, %c0_17], %21 {strides = array<i32>} : memref<1x4x256xf32, #tpu.memory_space<vmem>>, vector<1x4x256xf32>,
    return
  }
  func.func @transform_0(%arg0: i32) -> (i32, i32, i32) {
    %c0_i32 = arith.constant 0 : i32
    %c0_i32_0 = arith.constant 0 : i32
    %c0_i32_1 = arith.constant 0 : i32
    return %arg0, %c0_i32, %c0_i32_0 : i32, i32, i32
  }
  func.func @transform_1(%arg0: i32) -> (i32, i32) {
    %c0_i32 = arith.constant 0 : i32
    %c0_i32_0 = arith.constant 0 : i32
    %c0_i32_1 = arith.constant 0 : i32
    return %c0_i32, %c0_i32_0 : i32, i32
  }
  func.func @transform_2(%arg0: i32) -> (i32, i32) {
    %c0_i32 = arith.constant 0 : i32
    %c0_i32_0 = arith.constant 0 : i32
    %c0_i32_1 = arith.constant 0 : i32
    return %c0_i32, %c0_i32_0 : i32, i32
  }
  func.func @transform_3(%arg0: i32) -> (i32, i32) {
    %c0_i32 = arith.constant 0 : i32
    %c0_i32_0 = arith.constant 0 : i32
    %c0_i32_1 = arith.constant 0 : i32
    return %c0_i32, %c0_i32_0 : i32, i32
  }
  func.func @transform_4(%arg0: i32) -> (i32, i32) {
    %c0_i32 = arith.constant 0 : i32
    %c0_i32_0 = arith.constant 0 : i32
    %c0_i32_1 = arith.constant 0 : i32
    return %c0_i32, %c0_i32_0 : i32, i32
  }
  func.func @transform_5(%arg0: i32) -> (i32, i32, i32) {
    %c0_i32 = arith.constant 0 : i32
    %c0_i32_0 = arith.constant 0 : i32
    %c0_i32_1 = arith.constant 0 : i32
    return %arg0, %c0_i32, %c0_i32_0 : i32, i32, i32
  }
}

</mosaic_0001>

<bundles_post_ra>
// kernel: tpu_custom_call.1
= control target key start
LH: loop header
LB: loop body
LE: loop exit
PB: predicated region body
PF: predicated region fallthrough
CT: control target
= control target key end

     0   :  { %10 = vsyncpa [#allocation3], 0  ;;  %s781_s0 = inlined_call_operand.hbm [shape: f32[2,4,256], index: 0, kind: input, shape index: {}]   ;;  %s782_s1 = inlined_call_operand.vmem [shape: f32[4,8], index: 1, kind: input, shape index: {}]   ;;  %s783_s2 = inlined_call_operand.vmem [shape: f32[1,8], index: 2, kind: input, shape index: {}]   ;;  %s784_s3 = inlined_call_operand.vmem [shape: f32[8,4], index: 3, kind: input, shape index: {}]   ;;  %s785_s4 = inlined_call_operand.vmem [shape: f32[1,4], index: 4, kind: input, shape index: {}]   ;;  %s786_s5 = inlined_call_operand.hbm [shape: f32[2,4,256], index: 5, kind: output, shape index: {}]  }
   0x1   :  { %12 = vsyncpa [#allocation3 + $0x1], 0 }
   0x2   :  { %13 = vsyncpa [#allocation4], 0 }
   0x3   :  { %15 = vsyncpa [#allocation4 + $0x1], 0  ;;  %s638_s18 = smov 0   ;;  %s640_s19 = smov 0  }
   0x4   :  { %s642_s20 = smov 0   ;;  %s644_s21 = smov 0  }
   0x5 LB: > { %s659_s22 = sadd.s32 4294967295, %s605_s21   ;;  %s437_s23 = sadd.s32 4294967294, %s605_s21   ;;  %s605_s21 = sphi %s644_s21, %s796_s21   ;;  %s601_s20 = sphi %s642_s20, %s795_s20   ;;  %s597_s19 = sphi %s640_s19, %s794_s19   ;;  %s593_s18 = sphi %s638_s18, %s793_s18  }
   0x6   : > { %s663_s24 = sadd.s32 1, %s605_s21   ;;  %s28_s25 = sadd.s32 1, %s601_s20 }
   0x7   : > { %s25_s26 = ssub.s32 %s605_s21, %s663_s24  ;;  %p35_p0 = scmp.ne.s32.totalorder %s601_s20, %s597_s19 }
   0x8   : > { %p26_p1 = scmp.eq.s32.totalorder %s25_s26, 0  ;;  %p36_p2 = scmp.eq.s32.totalorder %s605_s21, 0 }
   0x9   : > { %p41_p3 = scmp.ne.s32.totalorder %s597_s19, %s593_s18  ;;  %p42_p4 = scmp.eq.s32.totalorder %s659_s22, 0 }
   0xa   : > { %s675_s27 = scalar_select %p26_p1, %s601_s20, %s28_s25  }
   0xb   : > { %p677_p5 = por %p36_p2, %p35_p0  ;;  %p681_p6 = por %p42_p4, %p41_p3 }
   0xc   : > { %p149_p7 = scmp.eq.s32.totalorder %s659_s22, 1  ;;  %p155_p8 = scmp.eq.s32.totalorder %s437_s23, 1 }
   0xd   : > { %p469_p10 = scmp.lt.s32.totalorder %s605_s21, 2  ;;  %s187_s7 = sand.u32 1, %s601_s20  }
   0xe   : > { %p688_p11 = por %p149_p7, %p35_p0  ;;  %p692_p12 = por %p155_p8, %p41_p3 }
   0xf   : > { %s455_s8 = sshll.u32 %s605_s21, 3  ;;  %s440_s9 = sshll.u32 %s187_s7, 3 }
  0x10   : > { %s196_s12 = scalar_lea.hbm %s781_s0, %s455_s8  ;;  %s191_s14 = scalar_lea.vmem [#allocation2], %s440_s9 }
  0x11   : > { %s198_s13 = sshll.u32 %s196_s12, 4  ;;  %s200_s15 = sshll.u32 %s191_s14, 4  ;;  %s199_s13 = int_to_ptr.hbm [resolvable:$true] %s198_s13  ;;  %s201_s15 = int_to_ptr.vmem [resolvable:$true] %s200_s15 }
  0x12   : > { %p703_p13 = pnand %p469_p10, %p677_p5  ;;  %p443_p0 = scmp.ge.s32.totalorder %s605_s21, 1 }
  0x13   : > { %p205_p1 = scmp.lt.s32.totalorder %s605_s21, 3  ;;  %s188_s17 = scalar_lea.sflag [#allocation3], %s187_s7 }
  0x14   : > { %s509_s23 = sshra.s32 %s199_s13, 4  ;;  %p513_p3 = pneg %p703_p13  ;;  %s510_s23 = int_to_ptr.hbm [resolvable:$true] %s509_s23 }
  0x15   : > { %s511_s25 = scalar_lea.hbm %s510_s23, 8  ;;  %s516_s28 = scalar_lea.hbm %s781_s0, 16 }
  0x16   : > { %p512_p2 = scmp.ne.s32.totalorder %s510_s23, %s511_s25  ;;  %p517_p5 = scmp.lt.s32.totalorder %s510_s23, %s781_s0 }
  0x17   : > { %p518_p8 = scmp.lt.s32.totalorder %s516_s28, %s511_s25 }
  0x18   : > { %p514_p4 = pnand %p513_p3, %p512_p2 }
  0x19   : > { %p519_p10 = por %p518_p8, %p517_p5 }
  0x1a   : > { %p515_p7 = pneg %p514_p4 }
  0x1c   : > { %p520_p9 = pnand %p519_p10, %p515_p7 }
  0x1e   : > { %523 = shalt.err (!%p520_p9)
}
  0x1f   : > { %464 = dma.hbm_to_vmem [thread:$0]  (!%p703_p13), %s199_s13, 128, %s201_s15, %s188_s17  }
  0x20   : > { %p206_p2 = pnand %p443_p0, %p205_p1 }
  0x21   : > { %s724_s7 = sand.u32 (!%p206_p2), 1, %s597_s19  }
  0x22   : > { %209 = sbr.rel (%p206_p2) target bundleno = 582 (0x246), region = 40  ;;  %s444_s11 = sshll.u32 (!%p206_p2), %s724_s7, 3 }
  0x23   : > { %s212_s12 = scalar_lea.sflag (!%p206_p2), [#allocation3], %s724_s7  ;;  %s215_s14 = scalar_lea.vmem (!%p206_p2), [#allocation2], %s444_s11 }
  0x27   : > { %584 = dma.done.wait (%p681_p6), %s212_s12, 128  }
  0x28   : > { %586 = vsyncadd (%p681_p6), %s212_s12, 4294967168  ;;  %v243_v0 = vld [vmem:[%s215_s14] sm:$0xff]  ;;  %vm250_vm0 = vcmask 1043456   ;;  %v257_v6 = vld [vmem:[%s782_s1] sm:$0xf]  ;;  %v260_v7 = vlaneseq  ;;  %vm263_vm1 = vcmask 31744  }
  0x29   : > { %245 = vst [vmem:[#allocation1] ss:$2 sm:$0xff] %v243_v0  ;;  %446 = vmatpush.msk.msra.mxu0 %vm250_vm0, %v257_v6  ;;  %v290_v12 = vld [vmem:[%s784_s3] sm:$0xff]  ;;  %vm292_vm2 = vcmask 64512   ;;  %v607_v35 = vmov 839922192  }
  0x2a   : > { %v261_v8 = vand.u32 127, %v260_v7  ;;  %311 = vmatpush.msra.mxu1 %v290_v12  ;;  %v258_v13 = vld [vmem:[%s783_s2] sm:$0x1]  ;;  %v337_v17 = vshrl.u32 %v260_v7, 7  ;;  %v344_v36 = vunpack.c.l.s4 %v607_v35  ;;  %s456_s8 = sshll.u32 %s659_s22, 3  ;;  %s242_s12 = scalar_lea.vmem [#allocation5], %s444_s11 }
  0x2b   : > { %v291_v18 = vld [vmem:[%s785_s4] sm:$0x1]  ;;  %s362_s10 = scalar_lea.hbm %s786_s5, %s456_s8  ;;  %s364_s14 = sshll.u32 %s242_s12, 4  ;;  %s365_s14 = int_to_ptr.vmem [resolvable:$true] %s364_s14 }
  0x2c   : > { %504 = vset.pattern.permute.xlu0 %v337_v17  ;;  %v345_v37 = vunpack.c.0.s8 %v344_v36  ;;  %s366_s13 = sshll.u32 %s362_s10, 4  ;;  %s351_s15 = scalar_lea.sflag [#allocation4], %s724_s7  ;;  %s367_s13 = int_to_ptr.hbm [resolvable:$true] %s366_s13 }
  0x2d   : > { %s553_s29 = sshra.s32 %s367_s13, 4  ;;  %s559_s23 = scalar_lea.hbm %s786_s5, 16  ;;  %s554_s29 = int_to_ptr.hbm [resolvable:$true] %s553_s29 }
  0x2e   : > { %s555_s22 = scalar_lea.hbm %s554_s29, 8  ;;  %p560_p0 = scmp.lt.s32.totalorder %s554_s29, %s786_s5 }
  0x2f   : > { %p556_p6 = scmp.ne.s32.totalorder %s554_s29, %s555_s22  ;;  %p561_p1 = scmp.lt.s32.totalorder %s559_s23, %s555_s22 }
  0x30   : > { %v246_v1 = vld.sshfl [vmem:[#allocation1] sm:$0xff pattern:$0x75316420]  ;;  %v247_v2 = vld.sshfl [vmem:[#allocation1 + $0x8] sm:$0xff pattern:$0x75316420] }
  0x31   : > { %v251_v3 = vsel %vm250_vm0, %v246_v1, 0.0  ;;  %v252_v4 = vsel %vm250_vm0, %v247_v2, 0.0  ;;  %p557_p9 = pnand %p556_p6, %p688_p11  ;;  %p562_p3 = por %p561_p1, %p560_p0 }
  0x32   : > { %v253_v5 = vadd.f32 %v252_v4, %v251_v3 }
  0x33   : > { %p558_p13 = pneg %p557_p9 }
  0x34   : > { %254 = vadd.xlane.f32.xlu0 %v253_v5 }
  0x35   : > { %p563_p4 = pnand %p562_p3, %p558_p13 }
  0xa7   : > { %v255_v9 = vpop.xlane.xlu0 %254 }
  0xa8   : > { %v256_v10 = vmul.f32 0.00390625, %v255_v9 }
  0xaa   : > { %v262_v11 = vperm.slane %v256_v10, %v261_v8 }
  0xac   : > { %447 = vmatmul.msk.f32.vlgmr.msra.gmra.mxu0 %vm263_vm1, %v262_v11 }
 0x129   : > { %v286_v14 = vpop.f32.mrf.mxu0 }
 0x12a   : > { %v287_v15 = vadd.f32 %v286_v14, %v258_v13 }
 0x12c   : > { %v289_v16 = vmax.f32 %v287_v15, 0.0 }
 0x12e   : > { %448 = vmatmul.msk.f32.vlgmr.msra.gmra.mxu1 %vm292_vm2, %v289_v16 }
 0x1ab   : > { %v313_v19 = vpop.f32.mrf.mxu1 }
 0x1ac   : > { %v314_v20 = vadd.f32 %v313_v19, %v291_v18 }
 0x1ae   : > { %v449_v21 = vmul.f32 -1.442695, %v314_v20 }
 0x1b0   : > { %505 = vpow2.f32 %v449_v21 }
 0x1b6   : > { %v506_v22 = vpop.eup %505 }
 0x1b7   : > { %v319_v23 = vadd.f32 1.0, %v506_v22 }
 0x1b9   : > { %507 = vrcp.f32 %v319_v23  ;;  %v331_v27 = vand.u32 2147483648, %v319_v23  ;;  %v329_v29 = vand.u32 2147483647, %v319_v23  ;;  %vm325_vm4 = vweird.f32 %v319_v23 }
 0x1bb   : > { %v332_v31 = vor.u32 1.1754944e-38, %v331_v27  ;;  %vm330_vm6 = vcmp.eq.f32.partialorder %v329_v29, 8.507059e+37 }
 0x1bf   : > { %v508_v24 = vpop.eup %507 }
 0x1c0   : > { %v321_v25 = vmul.f32 %v508_v24, %v319_v23  ;;  %vm326_vm3 = vweird.f32 %v508_v24 }
 0x1c1   : > { %vm327_vm5 = vmor %vm325_vm4, %vm326_vm3 }
 0x1c2   : > { %v322_v26 = vsub.f32 1.0, %v321_v25 }
 0x1c4   : > { %v323_v28 = vmul.f32 %v508_v24, %v322_v26 }
 0x1c6   : > { %v324_v30 = vadd.f32 %v508_v24, %v323_v28 }
 0x1c8   : > { %v328_v32 = vsel %vm327_vm5, %v508_v24, %v324_v30 }
 0x1c9   : > { %v333_v33 = vsel %vm330_vm6, %v332_v31, %v328_v32 }
 0x1ca   : > { %v335_v34 = vperm.slane %v333_v33, 0 }
 0x1cc   : > { %340 = vperm.xlu0 %504, %v335_v34  }
 0x23e   : > { %v341_v38 = vpop.permute.xlu0 %340 }
 0x23f   : > { %v346_v39 = vperm.slane %v341_v38, %v345_v37 }
 0x241   : > { %v348_v40 = vmul.f32 %v346_v39, %v243_v0 }
 0x243   : > { %349 = vst [vmem:[%s242_s12] sm:$0xff] %v348_v40 }
 0x244   : > { %566 = shalt.err (!%p563_p4)
}
 0x245   : > { %459 = dma.vmem_to_hbm [thread:$0]  (%p688_p11), %s365_s14, 128, %s367_s13, %s351_s15  }
 0x246 PF: > { %s378_s7 = sand.u32 1, %s593_s18   ;;  %p792_p7 = scmp.ge.s32.totalorder %s605_s21, 2 }
 0x247   : > { %s379_s26 = scalar_lea.sflag [#allocation4], %s378_s7 }
 0x248   : > { %p466_p5 = pnand %p792_p7, %p692_p12 }
 0x24a   : > { %p467_p8 = pneg %p466_p5 }
 0x24c   : > { %588 = dma.done.wait (%p467_p8), %s379_s26, 128  }
 0x24d   : > { %590 = vsyncadd (%p467_p8), %s379_s26, 4294967168  ;;  %p18_p10 = scmp.ge.s32.totalorder %s663_s24, 4   ;;  %s793_s18 = smov %s597_s19 }
 0x24e   : > { %s794_s19 = smov %s601_s20  ;;  %s795_s20 = smov %s675_s27 }
 0x24f   : > { %s796_s21 = smov %s663_s24  ;;  %20 = sbr.rel (!%p18_p10) target bundleno = 5 (0x5), region = 85 }
 0x254   :  { %385 = vsyncpa [#allocation3], 1 }
 0x255   :  { %387 = vsyncpa [#allocation3 + $0x1], 1 }
 0x256   :  { %388 = vsyncpa [#allocation4], 1 }
 0x257   :  { %390 = vsyncpa [#allocation4 + $0x1], 1 }

</bundles_post_ra>
